<compile_context>
chip_gen: v5e
topology: v5e:2x2
jax: 0.10.0
libtpu: 0.0.40
codegen_flags: <defaults>
</compile_context>

<pallas_src>
import jax
import jax.numpy as jnp
from jax.experimental import pallas as pl
from jax.experimental.pallas import tpu as pltpu


# ---------------------------------------------------------------------------
# Kernels
# ---------------------------------------------------------------------------

def _sc_kernel_resident(x_ref, w_ref, o_ref):
    """Dictionary (D.T) fully VMEM-resident: a single MXU dot per M tile."""
    o_ref[...] = jnp.dot(
        x_ref[...], w_ref[...], preferred_element_type=jnp.float32
    ).astype(o_ref.dtype)


def _sc_kernel_tiled(x_ref, w_ref, o_ref, acc_ref):
    """Generic tiled matmul with an f32 VMEM accumulator over the T axis."""
    k = pl.program_id(2)
    prod = jnp.dot(x_ref[...], w_ref[...], preferred_element_type=jnp.float32)

    @pl.when(k == 0)
    def _():                      # first reduction step: write, don't zero + add
        acc_ref[...] = prod

    @pl.when(k != 0)
    def _():
        acc_ref[...] += prod

    @pl.when(k == pl.num_programs(2) - 1)
    def _():
        o_ref[...] = acc_ref[...].astype(o_ref.dtype)


# ---------------------------------------------------------------------------
# Wrapper
# ---------------------------------------------------------------------------

_VMEM_WORKING_SET = 28 * 1024 * 1024   # v7x-safe (64 MiB physical VMEM)
_VMEM_LIMIT_BYTES = 48 * 1024 * 1024   # explicit scoped-VMEM limit (all gens)
_RESIDENT_W_BYTES = 16 * 1024 * 1024   # budget for a double-buffered D.T
_TINY_PROBLEM = 1 << 21                # M*K*T below this -> plain jnp.matmul


def _round_up(v, m):
    return (v + m - 1) // m * m


def _sublane(dtype):
    # Native sublane packing multiple per element width (f32 / bf16 / int8).
    return {4: 8, 2: 16, 1: 32}.get(jnp.dtype(dtype).itemsize, 8)


def _pick_tm(m, cap, sub):
    cap = max(128, min(int(cap), 512))
    # Largest MXU-friendly tile that still yields >=2 M blocks (keeps both v7x
    # TensorCores fed); otherwise one (possibly ragged) block covering M.
    for cand in (512, 256, 128):
        if cand <= cap and m >= 2 * cand:
            return cand
    return min(_round_up(m, sub), cap)


def sparse_coding(x, dic_weight):
    """Pallas forward of SparseCodingModule.

    x:          (..., T)   input signals
    dic_weight: (K, T)     dictionary D
    returns (C, dic_weight) with C = x @ D.T of shape (..., K)
    """
    *lead, T = x.shape
    K, T_w = dic_weight.shape
    assert T == T_w, "dictionary atom length must match the input's last dim"

    M = 1
    for d in lead:
        M *= d
    out_full_shape = (*lead, K)

    # Sub-tile problems: padding + pallas_call fixed cost dominate -> XLA matmul.
    if M * K * T < _TINY_PROBLEM or M < 2:
        return jnp.matmul(x, dic_weight.T), dic_weight

    itemsize = jnp.dtype(x.dtype).itemsize
    sub = _sublane(x.dtype)
    x2 = x.reshape(M, T)
    w = dic_weight.T                               # (T, K); hoisted out of kernel

    KP = _round_up(K, 128)
    resident_bytes = 2 * T * KP * itemsize         # conservative: double-buffered

    if resident_bytes <= _RESIDENT_W_BYTES:
        # ----- Path A: whole dictionary resident in VMEM ---------------------
        # Only the (tiny) dictionary is padded along K. X / output are left
        # unpadded: ragged M / K edges are masked by Pallas edge blocks, and
        # the contraction (T) dim is taken at full extent so no T padding is
        # ever needed.
        w_pad = jnp.pad(w, ((0, 0), (0, KP - K))) if KP != K else w

        row_bytes = 2 * (T + KP) * itemsize        # x + out rows, double-buffered
        tm_cap = (_VMEM_WORKING_SET - resident_bytes) // max(row_bytes, 1)
        tm = _pick_tm(M, tm_cap, sub)
        grid = (pl.cdiv(M, tm),)

        cost = pl.CostEstimate(
            flops=2 * M * K * T,
            transcendentals=0,
            bytes_accessed=(M * T + T * KP + M * K) * itemsize,
        )

        c = pl.pallas_call(
            _sc_kernel_resident,
            out_shape=jax.ShapeDtypeStruct((M, K), x.dtype),
            grid_spec=pltpu.PrefetchScalarGridSpec(
                num_scalar_prefetch=0,
                grid=grid,
                in_specs=[
                    pl.BlockSpec((tm, T), lambda i: (i, 0)),    # X tile
                    pl.BlockSpec((T, KP), lambda i: (0, 0)),    # D.T, resident
                ],
                out_specs=pl.BlockSpec((tm, KP), lambda i: (i, 0)),
            ),
            compiler_params=pltpu.CompilerParams(
                dimension_semantics=("parallel",),
                vmem_limit_bytes=_VMEM_LIMIT_BYTES,
            ),
            cost_estimate=cost,
        )(x2, w_pad)
        return c.reshape(out_full_shape), dic_weight

    # ----- Path B: large dictionary -> 3-D tiled matmul -------------------------
    tm = _pick_tm(M, 512, sub)
    tn = min(1024, KP)
    tk = min(1024, _round_up(T, 128))
    TP = _round_up(T, tk)

    # Contraction padding must be genuine zeros on both operands (garbage in a
    # ragged T block could be NaN/Inf and would corrupt kept outputs). M / K
    # raggedness needs no padding: those rows/columns never mix into kept output.
    x_pad = jnp.pad(x2, ((0, 0), (0, TP - T))) if TP != T else x2
    w_pad = jnp.pad(w, ((0, TP - T), (0, 0))) if TP != T else w

    grid = (pl.cdiv(M, tm), pl.cdiv(K, tn), TP // tk)
    cost = pl.CostEstimate(
        flops=2 * M * K * T,
        transcendentals=0,
        bytes_accessed=(M * TP * grid[1] + TP * K * grid[0] + M * K) * itemsize,
    )

    c = pl.pallas_call(
        _sc_kernel_tiled,
        out_shape=jax.ShapeDtypeStruct((M, K), x.dtype),
        grid_spec=pltpu.PrefetchScalarGridSpec(
            num_scalar_prefetch=0,
            grid=grid,
            in_specs=[
                pl.BlockSpec((tm, tk), lambda i, j, k: (i, k)),   # X tile
                pl.BlockSpec((tk, tn), lambda i, j, k: (k, j)),   # D.T tile
            ],
            out_specs=pl.BlockSpec((tm, tn), lambda i, j, k: (i, j)),
            scratch_shapes=[pltpu.VMEM((tm, tn), jnp.float32)],
        ),
        compiler_params=pltpu.CompilerParams(
            dimension_semantics=("parallel", "parallel", "arbitrary"),
            vmem_limit_bytes=_VMEM_LIMIT_BYTES,
        ),
        cost_estimate=cost,
    )(x_pad, w_pad)
    return c.reshape(out_full_shape), dic_weight


def sparse_coding_ref(x, dic_weight):
    """Pure-JAX reference mirroring the PyTorch forward."""
    C = jnp.matmul(x, dic_weight.T, precision=jax.lax.Precision.HIGHEST)
    return C, dic_weight


if __name__ == "__main__":
    key = jax.random.PRNGKey(0)
    kx, kd, kx2, kd2 = jax.random.split(key, 4)

    # Moderate shape: exercises the Pallas kernel (resident-dictionary path,
    # ragged M/K edges, no X/output padding). batch=2, seq=256, T=96, K=160.
    B, N, T, K = 2, 256, 96, 160
    x = jax.random.normal(kx, (B, N, T), dtype=jnp.float32)
    # kaiming_normal_ on (K, T): std = sqrt(2 / fan_in) with fan_in = T
    dic_weight = jax.random.normal(kd, (K, T), dtype=jnp.float32) * (2.0 / T) ** 0.5

    C, D_out = sparse_coding(x, dic_weight)
    C = jax.block_until_ready(C)
    C_ref, D_ref = sparse_coding_ref(x, dic_weight)

    assert C.shape == (B, N, K)
    assert D_out.shape == (K, T)
    assert jnp.allclose(C, C_ref, atol=1e-3, rtol=1e-3), "mismatch vs reference"
    assert jnp.array_equal(D_out, D_ref), "dictionary pass-through mismatch"

    # Tiny shape: goes through the small-problem escape hatch, still must match.
    Bt, Nt, Tt, Kt = 2, 16, 32, 64
    xt = jax.random.normal(kx2, (Bt, Nt, Tt), dtype=jnp.float32)
    dt = jax.random.normal(kd2, (Kt, Tt), dtype=jnp.float32) * (2.0 / Tt) ** 0.5
    Ct, Dt = sparse_coding(xt, dt)
    Ct = jax.block_until_ready(Ct)
    Ct_ref, _ = sparse_coding_ref(xt, dt)
    assert Ct.shape == (Bt, Nt, Kt)
    assert jnp.allclose(Ct, Ct_ref, atol=1e-3, rtol=1e-3), "tiny-path mismatch"

    print("KERNEL_OK")
</pallas_src>

<mosaic_0001>
module attributes {stable_mosaic.version = 11 : i64} {
  func.func @_sc_kernel_resident(%arg0: i32, %arg1: memref<256x96xf32, #tpu.memory_space<vmem>>, %arg2: memref<96x256xf32, #tpu.memory_space<vmem>>, %arg3: memref<256x256xf32, #tpu.memory_space<vmem>>) attributes {dimension_semantics = [#tpu.dimension_semantics<parallel>], iteration_bounds = array<i64: 2>, scalar_prefetch = 0 : i64, scratch_operands = 0 : i64, tpu.core_type = #tpu.core_type<tc>, window_params = [{transform_indices = @transform_0, window_bounds = array<i64: 256, 96>}, {pipeline_mode = #tpu.pipeline_mode<synchronous>, transform_indices = @transform_1, window_bounds = array<i64: 96, 256>}, {transform_indices = @transform_2, window_bounds = array<i64: 256, 256>}]} {
    %c0 = arith.constant 0 : index
    %c0_0 = arith.constant 0 : index
    %0 = vector.load %arg1[%c0, %c0_0] : memref<256x96xf32, #tpu.memory_space<vmem>>, vector<256x96xf32>
    %c0_1 = arith.constant 0 : index
    %c0_2 = arith.constant 0 : index
    %1 = vector.load %arg2[%c0_1, %c0_2] : memref<96x256xf32, #tpu.memory_space<vmem>>, vector<96x256xf32>
    %cst = arith.constant dense<0.000000e+00> : vector<256x256xf32>
    %2 = tpu.matmul %0, %1, %cst {dimension_numbers = #tpu.dot_dimension_numbers<[1], [0], [0], [1], [0, 0, 1, 1], [], []>} : vector<256x96xf32>, vector<96x256xf32>, vector<256x256xf32> -> vector<256x256xf32>
    %c0_3 = arith.constant 0 : index
    %c0_4 = arith.constant 0 : index
    %3 = vector.load %arg3[%c0_3, %c0_4] : memref<256x256xf32, #tpu.memory_space<vmem>>, vector<256x256xf32>
    tpu.vector_store %arg3[%c0_3, %c0_4], %2 {strides = array<i32>} : memref<256x256xf32, #tpu.memory_space<vmem>>, vector<256x256xf32>,
    return
  }
  func.func @transform_0(%arg0: i32) -> (i32, i32) {
    %c0_i32 = arith.constant 0 : i32
    %c0_i32_0 = arith.constant 0 : i32
    return %arg0, %c0_i32 : i32, i32
  }
  func.func @transform_1(%arg0: i32) -> (i32, i32) {
    %c0_i32 = arith.constant 0 : i32
    %c0_i32_0 = arith.constant 0 : i32
    %c0_i32_1 = arith.constant 0 : i32
    return %c0_i32, %c0_i32_0 : i32, i32
  }
  func.func @transform_2(%arg0: i32) -> (i32, i32) {
    %c0_i32 = arith.constant 0 : i32
    %c0_i32_0 = arith.constant 0 : i32
    return %arg0, %c0_i32 : i32, i32
  }
}

</mosaic_0001>

<bundles_post_ra>
// kernel: tpu_custom_call.1
= control target key start
LH: loop header
LB: loop body
LE: loop exit
PB: predicated region body
PF: predicated region fallthrough
CT: control target
= control target key end

     0   :  { %s782_s9 = smov 0   ;;  %s1039_s0 = inlined_call_operand.vmem [shape: f32[512,96], index: 0, kind: input, shape index: {}]   ;;  %s1040_s1 = inlined_call_operand.vmem [shape: f32[96,256], index: 1, kind: input, shape index: {}]   ;;  %s1041_s2 = inlined_call_operand.vmem [shape: f32[512,160], index: 2, kind: output, shape index: {}]  }
   0x1 LB: > { %s650_s10 = sadd.s32 4294967295, %s765_s9   ;;  %p654_p0 = scmp.ge.s32.totalorder %s765_s9, 1  ;;  %s765_s9 = sphi %s782_s9, %s12_s9  }
   0x2   : > { %p113_p1 = scmp.lt.s32.totalorder %s765_s9, 3 }
   0x4   : > { %p114_p2 = pnand %p654_p0, %p113_p1 }
   0x5   : > { %s655_s27 = sshll.u32 (!%p114_p2), %s650_s10, 5 }
   0x6   : > { %117 = sbr.rel (%p114_p2) target bundleno = 289 (0x121), region = 28  ;;  %p137_p3 = scmp.lt.s32.totalorder (!%p114_p2), %s655_s27, 63 }
   0xb   : > { %v203_v0 = vld [vmem:[%s1040_s1 + $0xb0] sm:$0xff]  ;;  %v204_v1 = vld [vmem:[%s1040_s1 + $0xb8] sm:$0xff]  ;;  %v201_v2 = vld [vmem:[%s1040_s1 + $0xa0] sm:$0xff]  ;;  %s1043_s27 = smov (!%p137_p3, %s655_s27), 63  ;;  %vm205_vm0 = vcmask 785408  }
   0xc   : > { %727 = vmatpush.msra.mxu2 %v203_v0  ;;  %739 = vmatpush.msra.mxu3 %v204_v1  ;;  %v202_v3 = vld [vmem:[%s1040_s1 + $0xa8] sm:$0xff]  ;;  %v199_v4 = vld [vmem:[%s1040_s1 + $0x90] sm:$0xff]  ;;  %v200_v5 = vld [vmem:[%s1040_s1 + $0x98] sm:$0xff]  ;;  %s656_s21 = sshll.u32 %s1043_s27, 3  ;;  %s726_s11 = sshll.u32 %s1043_s27, 4 }
   0xd   : > { %306 = vmatpush.msra.mxu0 %v203_v0  ;;  %419 = vmatpush.msra.mxu1 %v204_v1  ;;  %v197_v6 = vld [vmem:[%s1040_s1 + $0x80] sm:$0xff]  ;;  %v198_v7 = vld [vmem:[%s1040_s1 + $0x88] sm:$0xff]  ;;  %v195_v8 = vld [vmem:[%s1040_s1 + $0x70] sm:$0xff]  ;;  %s862_s5 = scalar_lea.vmem %s1039_s0, %s656_s21  ;;  %s970_s14 = scalar_lea.vmem %s1041_s2, %s726_s11 }
   0xe   : > { %728 = vmatpush.msra.mxu2 %v201_v2  ;;  %740 = vmatpush.msra.mxu3 %v202_v3  ;;  %v196_v9 = vld [vmem:[%s1040_s1 + $0x78] sm:$0xff]  ;;  %v193_v10 = vld [vmem:[%s1040_s1 + $0x60] sm:$0xff]  ;;  %v194_v11 = vld [vmem:[%s1040_s1 + $0x68] sm:$0xff] }
   0xf   : > { %307 = vmatpush.msra.mxu0 %v201_v2  ;;  %420 = vmatpush.msra.mxu1 %v202_v3  ;;  %v191_v12 = vld [vmem:[%s1040_s1 + $0x50] sm:$0xff]  ;;  %v192_v13 = vld [vmem:[%s1040_s1 + $0x58] sm:$0xff]  ;;  %v189_v14 = vld [vmem:[%s1040_s1 + $0x40] sm:$0xff] }
  0x10   : > { %729 = vmatpush.msra.mxu2 %v199_v4  ;;  %741 = vmatpush.msra.mxu3 %v200_v5  ;;  %v190_v15 = vld [vmem:[%s1040_s1 + $0x48] sm:$0xff]  ;;  %v187_v16 = vld [vmem:[%s1040_s1 + $0x30] sm:$0xff]  ;;  %v188_v17 = vld [vmem:[%s1040_s1 + $0x38] sm:$0xff] }
  0x11   : > { %308 = vmatpush.msra.mxu0 %v199_v4  ;;  %421 = vmatpush.msra.mxu1 %v200_v5  ;;  %v185_v18 = vld [vmem:[%s1040_s1 + $0x20] sm:$0xff]  ;;  %v186_v19 = vld [vmem:[%s1040_s1 + $0x28] sm:$0xff]  ;;  %v183_v20 = vld [vmem:[%s1040_s1 + $0x10] sm:$0xff] }
  0x12   : > { %730 = vmatpush.msra.mxu2 %v197_v6  ;;  %742 = vmatpush.msra.mxu3 %v198_v7  ;;  %v184_v21 = vld [vmem:[%s1040_s1 + $0x18] sm:$0xff]  ;;  %v181_v22 = vld [vmem:[%s1040_s1] sm:$0xff]  ;;  %v182_v23 = vld [vmem:[%s1040_s1 + $0x8] sm:$0xff] }
  0x13   : > { %309 = vmatpush.msra.mxu0 %v197_v6  ;;  %422 = vmatpush.msra.mxu1 %v198_v7  ;;  %v165_v24 = vld [vmem:[%s862_s5 + $0x80] sm:$0xff]  ;;  %v166_v26 = vld [vmem:[%s862_s5 + $0x88] sm:$0xff]  ;;  %v167_v28 = vld [vmem:[%s862_s5 + $0x90] sm:$0xff] }
  0x14   : > { %731 = vmatpush.msra.mxu2 %v195_v8  ;;  %743 = vmatpush.msra.mxu3 %v196_v9  ;;  %v149_v25 = vld [vmem:[%s862_s5] sm:$0xff]  ;;  %v150_v27 = vld [vmem:[%s862_s5 + $0x8] sm:$0xff]  ;;  %v151_v29 = vld [vmem:[%s862_s5 + $0x10] sm:$0xff] }
  0x15   : > { %310 = vmatpush.msra.mxu0 %v195_v8  ;;  %423 = vmatpush.msra.mxu1 %v196_v9  ;;  %v168_v30 = vld [vmem:[%s862_s5 + $0x98] sm:$0xff]  ;;  %v169_v32 = vld [vmem:[%s862_s5 + $0xa0] sm:$0xff]  ;;  %v170_v34 = vld [vmem:[%s862_s5 + $0xa8] sm:$0xff] }
  0x16   : > { %732 = vmatpush.msra.mxu2 %v193_v10  ;;  %744 = vmatpush.msra.mxu3 %v194_v11  ;;  %v152_v31 = vld [vmem:[%s862_s5 + $0x18] sm:$0xff]  ;;  %v153_v33 = vld [vmem:[%s862_s5 + $0x20] sm:$0xff]  ;;  %v154_v35 = vld [vmem:[%s862_s5 + $0x28] sm:$0xff] }
  0x17   : > { %311 = vmatpush.msra.mxu0 %v193_v10  ;;  %424 = vmatpush.msra.mxu1 %v194_v11  ;;  %v171_v36 = vld [vmem:[%s862_s5 + $0xb0] sm:$0xff]  ;;  %v172_v38 = vld [vmem:[%s862_s5 + $0xb8] sm:$0xff]  ;;  %v173_v40 = vld [vmem:[%s862_s5 + $0xc0] sm:$0xff] }
  0x18   : > { %733 = vmatpush.msra.mxu2 %v191_v12  ;;  %745 = vmatpush.msra.mxu3 %v192_v13  ;;  %v155_v37 = vld [vmem:[%s862_s5 + $0x30] sm:$0xff]  ;;  %v156_v39 = vld [vmem:[%s862_s5 + $0x38] sm:$0xff]  ;;  %v157_v41 = vld [vmem:[%s862_s5 + $0x40] sm:$0xff] }
  0x19   : > { %312 = vmatpush.msra.mxu0 %v191_v12  ;;  %425 = vmatpush.msra.mxu1 %v192_v13  ;;  %v174_v42 = vld [vmem:[%s862_s5 + $0xc8] sm:$0xff]  ;;  %v175_v44 = vld [vmem:[%s862_s5 + $0xd0] sm:$0xff]  ;;  %v176_v46 = vld [vmem:[%s862_s5 + $0xd8] sm:$0xff] }
  0x1a   : > { %734 = vmatpush.msra.mxu2 %v189_v14  ;;  %746 = vmatpush.msra.mxu3 %v190_v15  ;;  %v158_v43 = vld [vmem:[%s862_s5 + $0x48] sm:$0xff]  ;;  %v159_v45 = vld [vmem:[%s862_s5 + $0x50] sm:$0xff]  ;;  %v160_v47 = vld [vmem:[%s862_s5 + $0x58] sm:$0xff] }
  0x1b   : > { %313 = vmatpush.msra.mxu0 %v189_v14  ;;  %426 = vmatpush.msra.mxu1 %v190_v15  ;;  %v177_v48 = vld [vmem:[%s862_s5 + $0xe0] sm:$0xff]  ;;  %v178_v50 = vld [vmem:[%s862_s5 + $0xe8] sm:$0xff]  ;;  %v179_v52 = vld [vmem:[%s862_s5 + $0xf0] sm:$0xff] }
  0x1c   : > { %735 = vmatpush.msra.mxu2 %v187_v16  ;;  %747 = vmatpush.msra.mxu3 %v188_v17  ;;  %v161_v49 = vld [vmem:[%s862_s5 + $0x60] sm:$0xff]  ;;  %v162_v51 = vld [vmem:[%s862_s5 + $0x68] sm:$0xff]  ;;  %v163_v53 = vld [vmem:[%s862_s5 + $0x70] sm:$0xff] }
  0x1d   : > { %314 = vmatpush.msra.mxu0 %v187_v16  ;;  %427 = vmatpush.msra.mxu1 %v188_v17  ;;  %v180_v54 = vld [vmem:[%s862_s5 + $0xf8] sm:$0xff] }
  0x1e   : > { %736 = vmatpush.msra.mxu2 %v185_v18  ;;  %748 = vmatpush.msra.mxu3 %v186_v19  ;;  %v164_v55 = vld [vmem:[%s862_s5 + $0x78] sm:$0xff] }
  0x1f   : > { %315 = vmatpush.msra.mxu0 %v185_v18  ;;  %428 = vmatpush.msra.mxu1 %v186_v19 }
  0x20   : > { %737 = vmatpush.msra.mxu2 %v183_v20  ;;  %749 = vmatpush.msra.mxu3 %v184_v21 }
  0x21   : > { %316 = vmatpush.msra.mxu0 %v183_v20  ;;  %429 = vmatpush.msra.mxu1 %v184_v21 }
  0x22   : > { %738 = vmatpush.msra.mxu2 %v181_v22  ;;  %750 = vmatpush.msra.mxu3 %v182_v23 }
  0x23   : > { %676 = vmatmul.msk.f32.vlgmr.msra.gmra.mxu2 %vm205_vm0, %v165_v24  ;;  %708 = vmatmul.msk.f32.vlgmr.msra.gmra.mxu3 %vm205_vm0, %v165_v24 }
  0x24   : > { %317 = vmatpush.msra.mxu0 %v181_v22  ;;  %430 = vmatpush.msra.mxu1 %v182_v23 }
  0x25   : > { %660 = vmatmul.msk.f32.vlgmr.msra.gmra.mxu0 %vm205_vm0, %v149_v25  ;;  %692 = vmatmul.msk.f32.vlgmr.msra.gmra.mxu1 %vm205_vm0, %v149_v25 }
  0x2b   : > { %677 = vmatmul.msk.f32.gmra.mxu2 %vm205_vm0, %v166_v26  ;;  %709 = vmatmul.msk.f32.gmra.mxu3 %vm205_vm0, %v166_v26 }
  0x2d   : > { %661 = vmatmul.msk.f32.gmra.mxu0 %vm205_vm0, %v150_v27  ;;  %693 = vmatmul.msk.f32.gmra.mxu1 %vm205_vm0, %v150_v27 }
  0x33   : > { %678 = vmatmul.msk.f32.gmra.mxu2 %vm205_vm0, %v167_v28  ;;  %710 = vmatmul.msk.f32.gmra.mxu3 %vm205_vm0, %v167_v28 }
  0x35   : > { %662 = vmatmul.msk.f32.gmra.mxu0 %vm205_vm0, %v151_v29  ;;  %694 = vmatmul.msk.f32.gmra.mxu1 %vm205_vm0, %v151_v29 }
  0x3b   : > { %679 = vmatmul.msk.f32.gmra.mxu2 %vm205_vm0, %v168_v30  ;;  %711 = vmatmul.msk.f32.gmra.mxu3 %vm205_vm0, %v168_v30 }
  0x3d   : > { %663 = vmatmul.msk.f32.gmra.mxu0 %vm205_vm0, %v152_v31  ;;  %695 = vmatmul.msk.f32.gmra.mxu1 %vm205_vm0, %v152_v31 }
  0x43   : > { %680 = vmatmul.msk.f32.gmra.mxu2 %vm205_vm0, %v169_v32  ;;  %712 = vmatmul.msk.f32.gmra.mxu3 %vm205_vm0, %v169_v32 }
  0x45   : > { %664 = vmatmul.msk.f32.gmra.mxu0 %vm205_vm0, %v153_v33  ;;  %696 = vmatmul.msk.f32.gmra.mxu1 %vm205_vm0, %v153_v33 }
  0x4b   : > { %681 = vmatmul.msk.f32.gmra.mxu2 %vm205_vm0, %v170_v34  ;;  %713 = vmatmul.msk.f32.gmra.mxu3 %vm205_vm0, %v170_v34 }
  0x4d   : > { %665 = vmatmul.msk.f32.gmra.mxu0 %vm205_vm0, %v154_v35  ;;  %697 = vmatmul.msk.f32.gmra.mxu1 %vm205_vm0, %v154_v35 }
  0x53   : > { %682 = vmatmul.msk.f32.gmra.mxu2 %vm205_vm0, %v171_v36  ;;  %714 = vmatmul.msk.f32.gmra.mxu3 %vm205_vm0, %v171_v36 }
  0x55   : > { %666 = vmatmul.msk.f32.gmra.mxu0 %vm205_vm0, %v155_v37  ;;  %698 = vmatmul.msk.f32.gmra.mxu1 %vm205_vm0, %v155_v37 }
  0x5b   : > { %683 = vmatmul.msk.f32.gmra.mxu2 %vm205_vm0, %v172_v38  ;;  %715 = vmatmul.msk.f32.gmra.mxu3 %vm205_vm0, %v172_v38 }
  0x5d   : > { %667 = vmatmul.msk.f32.gmra.mxu0 %vm205_vm0, %v156_v39  ;;  %699 = vmatmul.msk.f32.gmra.mxu1 %vm205_vm0, %v156_v39 }
  0x63   : > { %684 = vmatmul.msk.f32.gmra.mxu2 %vm205_vm0, %v173_v40  ;;  %716 = vmatmul.msk.f32.gmra.mxu3 %vm205_vm0, %v173_v40 }
  0x65   : > { %668 = vmatmul.msk.f32.gmra.mxu0 %vm205_vm0, %v157_v41  ;;  %700 = vmatmul.msk.f32.gmra.mxu1 %vm205_vm0, %v157_v41 }
  0x6b   : > { %685 = vmatmul.msk.f32.gmra.mxu2 %vm205_vm0, %v174_v42  ;;  %717 = vmatmul.msk.f32.gmra.mxu3 %vm205_vm0, %v174_v42 }
  0x6d   : > { %669 = vmatmul.msk.f32.gmra.mxu0 %vm205_vm0, %v158_v43  ;;  %701 = vmatmul.msk.f32.gmra.mxu1 %vm205_vm0, %v158_v43 }
  0x73   : > { %686 = vmatmul.msk.f32.gmra.mxu2 %vm205_vm0, %v175_v44  ;;  %718 = vmatmul.msk.f32.gmra.mxu3 %vm205_vm0, %v175_v44 }
  0x75   : > { %670 = vmatmul.msk.f32.gmra.mxu0 %vm205_vm0, %v159_v45  ;;  %702 = vmatmul.msk.f32.gmra.mxu1 %vm205_vm0, %v159_v45 }
  0x7b   : > { %687 = vmatmul.msk.f32.gmra.mxu2 %vm205_vm0, %v176_v46  ;;  %719 = vmatmul.msk.f32.gmra.mxu3 %vm205_vm0, %v176_v46 }
  0x7d   : > { %671 = vmatmul.msk.f32.gmra.mxu0 %vm205_vm0, %v160_v47  ;;  %703 = vmatmul.msk.f32.gmra.mxu1 %vm205_vm0, %v160_v47 }
  0x83   : > { %688 = vmatmul.msk.f32.gmra.mxu2 %vm205_vm0, %v177_v48  ;;  %720 = vmatmul.msk.f32.gmra.mxu3 %vm205_vm0, %v177_v48 }
  0x85   : > { %672 = vmatmul.msk.f32.gmra.mxu0 %vm205_vm0, %v161_v49  ;;  %704 = vmatmul.msk.f32.gmra.mxu1 %vm205_vm0, %v161_v49 }
  0x8b   : > { %689 = vmatmul.msk.f32.gmra.mxu2 %vm205_vm0, %v178_v50  ;;  %721 = vmatmul.msk.f32.gmra.mxu3 %vm205_vm0, %v178_v50 }
  0x8d   : > { %673 = vmatmul.msk.f32.gmra.mxu0 %vm205_vm0, %v162_v51  ;;  %705 = vmatmul.msk.f32.gmra.mxu1 %vm205_vm0, %v162_v51 }
  0x93   : > { %690 = vmatmul.msk.f32.gmra.mxu2 %vm205_vm0, %v179_v52  ;;  %722 = vmatmul.msk.f32.gmra.mxu3 %vm205_vm0, %v179_v52 }
  0x95   : > { %674 = vmatmul.msk.f32.gmra.mxu0 %vm205_vm0, %v163_v53  ;;  %706 = vmatmul.msk.f32.gmra.mxu1 %vm205_vm0, %v163_v53 }
  0x9b   : > { %691 = vmatmul.msk.f32.gmra.mxu2 %vm205_vm0, %v180_v54  ;;  %723 = vmatmul.msk.f32.gmra.mxu3 %vm205_vm0, %v180_v54 }
  0x9d   : > { %675 = vmatmul.msk.f32.gmra.mxu0 %vm205_vm0, %v164_v55  ;;  %707 = vmatmul.msk.f32.gmra.mxu1 %vm205_vm0, %v164_v55 }
  0xa2   : > { %v319_v56 = vpop.f32.mrf.mxu0  ;;  %v432_v57 = vpop.f32.mrf.mxu1 }
  0xa3   : > { %528 = vst [vmem:[%s970_s14] sm:$0xff] %v319_v56 }
  0xa4   : > { %529 = vst [vmem:[%s970_s14 + $0x8] sm:$0xff] %v432_v57 }
  0xa6   : > { %v367_v58 = vpop.f32.mrf.mxu2  ;;  %v480_v59 = vpop.f32.mrf.mxu3 }
  0xa7   : > { %560 = vst [vmem:[%s970_s14 + $0x100] sm:$0xff] %v367_v58 }
  0xa8   : > { %561 = vst [vmem:[%s970_s14 + $0x108] sm:$0xff] %v480_v59 }
  0xaa   : > { %v322_v60 = vpop.f32.mrf.mxu0  ;;  %v435_v61 = vpop.f32.mrf.mxu1 }
  0xab   : > { %530 = vst [vmem:[%s970_s14 + $0x10] sm:$0xff] %v322_v60 }
  0xac   : > { %531 = vst [vmem:[%s970_s14 + $0x18] sm:$0xff] %v435_v61 }
  0xae   : > { %v370_v62 = vpop.f32.mrf.mxu2  ;;  %v483_v63 = vpop.f32.mrf.mxu3 }
  0xaf   : > { %562 = vst [vmem:[%s970_s14 + $0x110] sm:$0xff] %v370_v62 }
  0xb0   : > { %563 = vst [vmem:[%s970_s14 + $0x118] sm:$0xff] %v483_v63 }
  0xb2   : > { %v325_v0 = vpop.f32.mrf.mxu0  ;;  %v438_v1 = vpop.f32.mrf.mxu1 }
  0xb3   : > { %532 = vst [vmem:[%s970_s14 + $0x20] sm:$0xff] %v325_v0 }
  0xb4   : > { %533 = vst [vmem:[%s970_s14 + $0x28] sm:$0xff] %v438_v1 }
  0xb6   : > { %v373_v2 = vpop.f32.mrf.mxu2  ;;  %v486_v3 = vpop.f32.mrf.mxu3 }
  0xb7   : > { %564 = vst [vmem:[%s970_s14 + $0x120] sm:$0xff] %v373_v2 }
  0xb8   : > { %565 = vst [vmem:[%s970_s14 + $0x128] sm:$0xff] %v486_v3 }
  0xba   : > { %v328_v4 = vpop.f32.mrf.mxu0  ;;  %v441_v5 = vpop.f32.mrf.mxu1 }
  0xbb   : > { %534 = vst [vmem:[%s970_s14 + $0x30] sm:$0xff] %v328_v4 }
  0xbc   : > { %535 = vst [vmem:[%s970_s14 + $0x38] sm:$0xff] %v441_v5 }
  0xbe   : > { %v376_v6 = vpop.f32.mrf.mxu2  ;;  %v489_v7 = vpop.f32.mrf.mxu3 }
  0xbf   : > { %566 = vst [vmem:[%s970_s14 + $0x130] sm:$0xff] %v376_v6 }
  0xc0   : > { %567 = vst [vmem:[%s970_s14 + $0x138] sm:$0xff] %v489_v7 }
  0xc2   : > { %v331_v8 = vpop.f32.mrf.mxu0  ;;  %v444_v9 = vpop.f32.mrf.mxu1 }
  0xc3   : > { %536 = vst [vmem:[%s970_s14 + $0x40] sm:$0xff] %v331_v8 }
  0xc4   : > { %537 = vst [vmem:[%s970_s14 + $0x48] sm:$0xff] %v444_v9 }
  0xc6   : > { %v379_v10 = vpop.f32.mrf.mxu2  ;;  %v492_v11 = vpop.f32.mrf.mxu3 }
  0xc7   : > { %568 = vst [vmem:[%s970_s14 + $0x140] sm:$0xff] %v379_v10 }
  0xc8   : > { %569 = vst [vmem:[%s970_s14 + $0x148] sm:$0xff] %v492_v11 }
  0xca   : > { %v334_v12 = vpop.f32.mrf.mxu0  ;;  %v447_v13 = vpop.f32.mrf.mxu1 }
  0xcb   : > { %538 = vst [vmem:[%s970_s14 + $0x50] sm:$0xff] %v334_v12 }
  0xcc   : > { %539 = vst [vmem:[%s970_s14 + $0x58] sm:$0xff] %v447_v13 }
  0xce   : > { %v382_v14 = vpop.f32.mrf.mxu2  ;;  %v495_v15 = vpop.f32.mrf.mxu3 }
  0xcf   : > { %570 = vst [vmem:[%s970_s14 + $0x150] sm:$0xff] %v382_v14 }
  0xd0   : > { %571 = vst [vmem:[%s970_s14 + $0x158] sm:$0xff] %v495_v15 }
  0xd2   : > { %v337_v16 = vpop.f32.mrf.mxu0  ;;  %v450_v17 = vpop.f32.mrf.mxu1 }
  0xd3   : > { %540 = vst [vmem:[%s970_s14 + $0x60] sm:$0xff] %v337_v16 }
  0xd4   : > { %541 = vst [vmem:[%s970_s14 + $0x68] sm:$0xff] %v450_v17 }
  0xd6   : > { %v385_v18 = vpop.f32.mrf.mxu2  ;;  %v498_v19 = vpop.f32.mrf.mxu3 }
  0xd7   : > { %572 = vst [vmem:[%s970_s14 + $0x160] sm:$0xff] %v385_v18 }
  0xd8   : > { %573 = vst [vmem:[%s970_s14 + $0x168] sm:$0xff] %v498_v19 }
  0xda   : > { %v340_v20 = vpop.f32.mrf.mxu0  ;;  %v453_v21 = vpop.f32.mrf.mxu1 }
  0xdb   : > { %542 = vst [vmem:[%s970_s14 + $0x70] sm:$0xff] %v340_v20 }
  0xdc   : > { %543 = vst [vmem:[%s970_s14 + $0x78] sm:$0xff] %v453_v21 }
  0xde   : > { %v388_v22 = vpop.f32.mrf.mxu2  ;;  %v501_v23 = vpop.f32.mrf.mxu3 }
  0xdf   : > { %574 = vst [vmem:[%s970_s14 + $0x170] sm:$0xff] %v388_v22 }
  0xe0   : > { %575 = vst [vmem:[%s970_s14 + $0x178] sm:$0xff] %v501_v23 }
  0xe2   : > { %v343_v24 = vpop.f32.mrf.mxu0  ;;  %v456_v25 = vpop.f32.mrf.mxu1 }
  0xe3   : > { %544 = vst [vmem:[%s970_s14 + $0x80] sm:$0xff] %v343_v24 }
  0xe4   : > { %545 = vst [vmem:[%s970_s14 + $0x88] sm:$0xff] %v456_v25 }
  0xe6   : > { %v391_v26 = vpop.f32.mrf.mxu2  ;;  %v504_v27 = vpop.f32.mrf.mxu3 }
  0xe7   : > { %576 = vst [vmem:[%s970_s14 + $0x180] sm:$0xff] %v391_v26 }
  0xe8   : > { %577 = vst [vmem:[%s970_s14 + $0x188] sm:$0xff] %v504_v27 }
  0xea   : > { %v346_v28 = vpop.f32.mrf.mxu0  ;;  %v459_v29 = vpop.f32.mrf.mxu1 }
  0xeb   : > { %546 = vst [vmem:[%s970_s14 + $0x90] sm:$0xff] %v346_v28 }
  0xec   : > { %547 = vst [vmem:[%s970_s14 + $0x98] sm:$0xff] %v459_v29 }
  0xee   : > { %v394_v30 = vpop.f32.mrf.mxu2  ;;  %v507_v31 = vpop.f32.mrf.mxu3 }
  0xef   : > { %578 = vst [vmem:[%s970_s14 + $0x190] sm:$0xff] %v394_v30 }
  0xf0   : > { %579 = vst [vmem:[%s970_s14 + $0x198] sm:$0xff] %v507_v31 }
  0xf2   : > { %v349_v32 = vpop.f32.mrf.mxu0  ;;  %v462_v33 = vpop.f32.mrf.mxu1 }
  0xf3   : > { %548 = vst [vmem:[%s970_s14 + $0xa0] sm:$0xff] %v349_v32 }
  0xf4   : > { %549 = vst [vmem:[%s970_s14 + $0xa8] sm:$0xff] %v462_v33 }
  0xf6   : > { %v397_v34 = vpop.f32.mrf.mxu2  ;;  %v510_v35 = vpop.f32.mrf.mxu3 }
  0xf7   : > { %580 = vst [vmem:[%s970_s14 + $0x1a0] sm:$0xff] %v397_v34 }
  0xf8   : > { %581 = vst [vmem:[%s970_s14 + $0x1a8] sm:$0xff] %v510_v35 }
  0xfa   : > { %v352_v36 = vpop.f32.mrf.mxu0  ;;  %v465_v37 = vpop.f32.mrf.mxu1 }
  0xfb   : > { %550 = vst [vmem:[%s970_s14 + $0xb0] sm:$0xff] %v352_v36 }
  0xfc   : > { %551 = vst [vmem:[%s970_s14 + $0xb8] sm:$0xff] %v465_v37 }
  0xfe   : > { %v400_v38 = vpop.f32.mrf.mxu2  ;;  %v513_v39 = vpop.f32.mrf.mxu3 }
  0xff   : > { %582 = vst [vmem:[%s970_s14 + $0x1b0] sm:$0xff] %v400_v38 }
 0x100   : > { %583 = vst [vmem:[%s970_s14 + $0x1b8] sm:$0xff] %v513_v39 }
 0x102   : > { %v355_v40 = vpop.f32.mrf.mxu0  ;;  %v468_v41 = vpop.f32.mrf.mxu1 }
 0x103   : > { %552 = vst [vmem:[%s970_s14 + $0xc0] sm:$0xff] %v355_v40 }
 0x104   : > { %553 = vst [vmem:[%s970_s14 + $0xc8] sm:$0xff] %v468_v41 }
 0x106   : > { %v403_v42 = vpop.f32.mrf.mxu2  ;;  %v516_v43 = vpop.f32.mrf.mxu3 }
 0x107   : > { %584 = vst [vmem:[%s970_s14 + $0x1c0] sm:$0xff] %v403_v42 }
 0x108   : > { %585 = vst [vmem:[%s970_s14 + $0x1c8] sm:$0xff] %v516_v43 }
 0x10a   : > { %v358_v44 = vpop.f32.mrf.mxu0  ;;  %v471_v45 = vpop.f32.mrf.mxu1 }
 0x10b   : > { %554 = vst [vmem:[%s970_s14 + $0xd0] sm:$0xff] %v358_v44 }
 0x10c   : > { %555 = vst [vmem:[%s970_s14 + $0xd8] sm:$0xff] %v471_v45 }
 0x10e   : > { %v406_v46 = vpop.f32.mrf.mxu2  ;;  %v519_v47 = vpop.f32.mrf.mxu3 }
 0x10f   : > { %586 = vst [vmem:[%s970_s14 + $0x1d0] sm:$0xff] %v406_v46 }
 0x110   : > { %587 = vst [vmem:[%s970_s14 + $0x1d8] sm:$0xff] %v519_v47 }
 0x112   : > { %v361_v48 = vpop.f32.mrf.mxu0  ;;  %v474_v49 = vpop.f32.mrf.mxu1 }
 0x113   : > { %556 = vst [vmem:[%s970_s14 + $0xe0] sm:$0xff] %v361_v48 }
 0x114   : > { %557 = vst [vmem:[%s970_s14 + $0xe8] sm:$0xff] %v474_v49 }
 0x116   : > { %v409_v50 = vpop.f32.mrf.mxu2  ;;  %v522_v51 = vpop.f32.mrf.mxu3 }
 0x117   : > { %588 = vst [vmem:[%s970_s14 + $0x1e0] sm:$0xff] %v409_v50 }
 0x118   : > { %589 = vst [vmem:[%s970_s14 + $0x1e8] sm:$0xff] %v522_v51 }
 0x11a   : > { %v364_v52 = vpop.f32.mrf.mxu0  ;;  %v477_v53 = vpop.f32.mrf.mxu1 }
 0x11b   : > { %558 = vst [vmem:[%s970_s14 + $0xf0] sm:$0xff] %v364_v52 }
 0x11c   : > { %559 = vst [vmem:[%s970_s14 + $0xf8] sm:$0xff] %v477_v53 }
 0x11e   : > { %v412_v54 = vpop.f32.mrf.mxu2  ;;  %v525_v55 = vpop.f32.mrf.mxu3 }
 0x11f   : > { %590 = vst [vmem:[%s970_s14 + $0x1f0] sm:$0xff] %v412_v54 }
 0x120   : > { %591 = vst [vmem:[%s970_s14 + $0x1f8] sm:$0xff] %v525_v55 }
 0x121 PF: > { %s12_s9 = sadd.s32 1, %s765_s9  }
 0x122   : > { %p9_p4 = scmp.ge.s32.totalorder %s12_s9, 4  }
 0x124   :  { %11 = sbr.rel (!%p9_p4) target bundleno = 1 (0x1), region = 58 }

</bundles_post_ra>
